<compile_context>
chip_gen: v7x
topology: tpu7x:2x2x1
jax: 0.10.0
libtpu: 0.0.40
codegen_flags: <defaults>
</compile_context>

<pallas_src>
import numpy as np

import jax
import jax.numpy as jnp
from jax import lax
from jax.experimental import pallas as pl
from jax.experimental.pallas import tpu as pltpu


def _pick_r(L, c_in, lane_cap=128):
    """Packing factor: largest divisor of L with r * c_in <= lane_cap."""
    r_max = max(1, lane_cap // c_in)
    r = 1
    for cand in range(1, r_max + 1):
        if L % cand == 0:
            r = cand
    return r


def _pick_m_tile(m_total, cap=1024):
    """Largest multiple-of-8 divisor of m_total that is <= cap while keeping at
    least 2 grid steps (v7x megacore).  Falls back to a single full tile for
    tiny or awkward m_total."""
    best = None
    d = 8
    limit = min(cap, m_total // 2)
    while d <= limit:
        if m_total % d == 0:
            best = d
        d += 8
    # TODO(synk): for huge m_total with no usable multiple-of-8 divisor, pad M
    # up to a tileable size instead of using one giant tile.
    return best if best is not None else m_total


def prepare_conv_params(weight, bias, *, L, compute_dtype=jnp.float32):
    """One-time preprocessing of PyTorch-layout Conv1d parameters.

    weight: (C_out, C_in, K)   bias: (C_out,)
    Returns dict with:
      r  : positions packed per row (depends on L and C_in)
      wm : (r*C_in,     r*C_out)  banded weight applied to the packed row
      wh : (2*pad*C_in, r*C_out)  weight applied to the prev/next-row halo lanes
      bp : (1, r*C_out)           f32 bias tiled over packed positions
    """
    w = np.asarray(weight, dtype=np.float32)
    b = np.asarray(bias, dtype=np.float32)
    c_out, c_in, K = w.shape
    pad = (K - 1) // 2
    assert K == 2 * pad + 1, "only 'same' Conv1d (odd win, pad=(win-1)//2)"
    # TODO(synk): win == 1 (pad == 0) would need a halo-free kernel variant.
    assert pad >= 1

    r = _pick_r(L, c_in)
    # TODO(synk): windows spanning more than one neighbouring packed row
    # (pad > r) are not supported.
    assert pad <= r, "pad must not exceed the packing factor"

    # wm[e, ci, j, o]: input position e (within the packed row) -> output pos j.
    # wh[s, ci, j, o]: halo slot s (0..pad-1 = prev row last pad positions,
    #                  pad..2*pad-1 = next row first pad positions) -> output j.
    wm = np.zeros((r, c_in, r, c_out), np.float32)
    wh = np.zeros((2 * pad, c_in, r, c_out), np.float32)
    for j in range(r):
        for k in range(K):
            e = j + k - pad                    # input position offset in block
            tap = w[:, :, k].T                 # (c_in, c_out)
            if 0 <= e < r:
                wm[e, :, j, :] += tap
            elif e < 0:                        # previous packed row
                wh[pad + e, :, j, :] += tap
            else:                              # next packed row
                wh[pad + (e - r), :, j, :] += tap

    return dict(
        r=r, pad=pad, c_in=c_in, c_out=c_out,
        wm=jnp.asarray(wm.reshape(r * c_in, r * c_out), compute_dtype),
        wh=jnp.asarray(wh.reshape(2 * pad * c_in, r * c_out), compute_dtype),
        bp=jnp.asarray(np.tile(b, r).reshape(1, r * c_out), jnp.float32),
    )


def cnn_layer_forward(x, params, *, m_tile=None):
    """x: (B, L, C_in) -> (B, L, C_out); params from prepare_conv_params(L=L)."""
    B, L, c_in = x.shape
    r, pad, c_out = params["r"], params["pad"], params["c_out"]
    assert params["c_in"] == c_in
    assert L % r == 0, "params were prepared for a different L"
    wm, wh, bp = params["wm"], params["wh"], params["bp"]

    Lp = L // r
    hc = pad * c_in                     # halo lanes per side
    kc = r * c_in                       # packed-row lane width (~128)
    N = r * c_out                       # packed output lane width
    M = B * Lp                          # total packed rows
    out_dtype = x.dtype
    cdt = wm.dtype                      # compute dtype (f32 or bf16)

    # Free row-major reshape: lane-pack r positions per row (same HBM bytes).
    x_p = x.reshape(B, Lp, kc)
    # Halo lanes for every packed row: last/first pad*c_in lanes of the
    # previous/next packed row, zeros at sequence ends (== conv zero padding).
    # Tiny wrapper op (~2*pad/r of x); removes all halo handling from the kernel.
    # TODO(synk): for c_in >= 128 (r == 1) an in-kernel im2col variant would
    # avoid this extra halo-lane traffic.
    left = jnp.pad(x_p[:, :-1, kc - hc:], ((0, 0), (1, 0), (0, 0)))
    right = jnp.pad(x_p[:, 1:, :hc], ((0, 0), (0, 1), (0, 0)))
    xh = jnp.concatenate([left, right], axis=-1).reshape(M, 2 * hc)
    x_flat = x_p.reshape(M, kc)

    tm = m_tile if m_tile is not None else _pick_m_tile(M)
    assert M % tm == 0, "m_tile must divide B * L // r"

    # Epilogue row-chunking: bounds the live f32 accumulator and store pressure
    # (v5e has a single vector-store slot).
    chunk = 256 if (tm > 256 and tm % 256 == 0) else tm
    n_chunks = tm // chunk

    def kernel(xm_ref, xh_ref, wm_ref, wh_ref, b_ref, o_ref):
        wm_v = wm_ref[...]
        wh_v = wh_ref[...]
        b_v = b_ref[...]                                   # (1, N) f32

        def do_chunk(c):
            rs = pl.multiple_of(c * chunk, chunk)
            xm = xm_ref[pl.ds(rs, chunk), :].astype(cdt)   # in-kernel cast only
            xv = xh_ref[pl.ds(rs, chunk), :].astype(cdt)
            acc = jnp.dot(xm, wm_v, preferred_element_type=jnp.float32)
            acc = acc + jnp.dot(xv, wh_v, preferred_element_type=jnp.float32)
            o_ref[pl.ds(rs, chunk), :] = (acc + b_v).astype(o_ref.dtype)

        if n_chunks == 1:
            do_chunk(0)
        else:
            def loop_body(c, carry):
                do_chunk(c)
                return carry
            lax.fori_loop(0, n_chunks, loop_body, 0, unroll=True)

    # VMEM budget: double-buffered streams + resident weights (+ headroom).
    io_bytes = tm * (kc + 2 * hc) * x.dtype.itemsize + tm * N * jnp.dtype(out_dtype).itemsize
    w_bytes = ((kc + 2 * hc) * N) * wm.dtype.itemsize + N * 4
    vmem_needed = 2 * io_bytes + 2 * w_bytes
    vmem_limit = int(min(64 * 2**20, max(32 * 2**20, 2 * vmem_needed)))

    cost = pl.CostEstimate(
        flops=2 * M * (kc + 2 * hc) * N,
        transcendentals=0,
        bytes_accessed=(x_flat.size * x_flat.dtype.itemsize
                        + xh.size * xh.dtype.itemsize
                        + wm.size * wm.dtype.itemsize
                        + wh.size * wh.dtype.itemsize
                        + bp.size * 4
                        + M * N * jnp.dtype(out_dtype).itemsize),
    )

    out_flat = pl.pallas_call(
        kernel,
        out_shape=jax.ShapeDtypeStruct((M, N), out_dtype),
        grid=(M // tm,),
        in_specs=[
            pl.BlockSpec((tm, kc), lambda i: (i, 0)),        # packed x rows
            pl.BlockSpec((tm, 2 * hc), lambda i: (i, 0)),    # halo lanes
            # TODO(synk): pipeline_mode=pl.Buffered(1) on these constant-index
            # weight/bias specs would halve their VMEM on v7x for big channels.
            pl.BlockSpec((kc, N), lambda i: (0, 0)),         # Wm (resident)
            pl.BlockSpec((2 * hc, N), lambda i: (0, 0)),     # Wh (resident)
            pl.BlockSpec((1, N), lambda i: (0, 0)),          # bias (f32)
        ],
        out_specs=pl.BlockSpec((tm, N), lambda i: (i, 0)),   # unpadded output
        compiler_params=pltpu.CompilerParams(
            dimension_semantics=("parallel",),
            vmem_limit_bytes=vmem_limit,
        ),
        cost_estimate=cost,
    )(x_flat, xh, wm, wh, bp)

    # Free reshape back: (B*Lp, r*C_out) and (B, L, C_out) are the same bytes.
    return out_flat.reshape(B, L, c_out)


def _reference(x, weight, bias, pad=1):
    # lax conv reference mimicking nn.Conv1d (NCL layout) + the permutes.
    x_ncl = jnp.transpose(x, (0, 2, 1))
    y = lax.conv_general_dilated(
        x_ncl, weight, window_strides=(1,), padding=[(pad, pad)],
        dimension_numbers=("NCH", "OIH", "NCH"))
    y = y + bias[None, :, None]
    return jnp.transpose(y, (0, 2, 1))


if __name__ == "__main__":
    B, L, in_dim, out_dim, win, pad = 2, 16, 8, 16, 3, 1

    key = jax.random.PRNGKey(0)
    kx, kw, kb = jax.random.split(key, 3)
    x = jax.random.normal(kx, (B, L, in_dim), dtype=jnp.float32)
    bound = 1.0 / jnp.sqrt(jnp.float32(in_dim * win))
    weight = jax.random.uniform(kw, (out_dim, in_dim, win), jnp.float32, -bound, bound)
    bias = jax.random.uniform(kb, (out_dim,), jnp.float32, -bound, bound)

    ref = _reference(x, weight, bias, pad=pad)

    # ---- f32 path (single packed block per sequence: halo lanes all zero) ----
    p32 = prepare_conv_params(weight, bias, L=L)
    out = jax.block_until_ready(cnn_layer_forward(x, p32))
    assert out.shape == (B, L, out_dim), out.shape
    assert jnp.allclose(out, ref, atol=1e-4, rtol=1e-4), "f32 mismatch vs lax.conv"

    # ---- bf16-weight path (x stays f32 in HBM, cast in-kernel; f32 accum) ----
    pbf = prepare_conv_params(weight, bias, L=L, compute_dtype=jnp.bfloat16)
    out_bf = jax.block_until_ready(cnn_layer_forward(x, pbf))
    assert jnp.allclose(out_bf, ref, atol=5e-2, rtol=5e-2), "bf16 mismatch"

    # ---- multi-tile path: cross-packed-block halos + 2 parallel grid steps ----
    B2, L2 = 4, 512
    x2 = jax.random.normal(jax.random.PRNGKey(1), (B2, L2, in_dim), jnp.float32)
    p2 = prepare_conv_params(weight, bias, L=L2)
    out2 = jax.block_until_ready(cnn_layer_forward(x2, p2))
    ref2 = _reference(x2, weight, bias, pad=pad)
    assert out2.shape == (B2, L2, out_dim), out2.shape
    assert jnp.allclose(out2, ref2, atol=1e-4, rtol=1e-4), "tiled mismatch"

    # ---- large-tile path exercising the chunked (fori_loop) epilogue ----
    B3, L3 = 8, 2048
    x3 = jax.random.normal(jax.random.PRNGKey(2), (B3, L3, in_dim), jnp.float32)
    p3 = prepare_conv_params(weight, bias, L=L3)
    out3 = jax.block_until_ready(cnn_layer_forward(x3, p3))
    ref3 = _reference(x3, weight, bias, pad=pad)
    assert jnp.allclose(out3, ref3, atol=1e-4, rtol=1e-4), "chunked mismatch"

    # ---- non-128-aligned packing (r*C_in = 96, r*C_out = 192) ----
    B4, L4 = 2, 24
    x4 = jax.random.normal(jax.random.PRNGKey(3), (B4, L4, in_dim), jnp.float32)
    p4 = prepare_conv_params(weight, bias, L=L4)
    out4 = jax.block_until_ready(cnn_layer_forward(x4, p4))
    ref4 = _reference(x4, weight, bias, pad=pad)
    assert jnp.allclose(out4, ref4, atol=1e-4, rtol=1e-4), "unaligned-r mismatch"

    print("KERNEL_OK")
</pallas_src>

<mosaic_0001>
module attributes {stable_mosaic.version = 11 : i64} {
  func.func @kernel(%arg0: i32, %arg1: memref<2x128xf32, #tpu.memory_space<vmem>>, %arg2: memref<2x16xf32, #tpu.memory_space<vmem>>, %arg3: memref<128x256xf32, #tpu.memory_space<vmem>>, %arg4: memref<16x256xf32, #tpu.memory_space<vmem>>, %arg5: memref<1x256xf32, #tpu.memory_space<vmem>>, %arg6: memref<2x256xf32, #tpu.memory_space<vmem>>) attributes {dimension_semantics = [#tpu.dimension_semantics<parallel>], iteration_bounds = array<i64: 1>, scalar_prefetch = 0 : i64, scratch_operands = 0 : i64, tpu.core_type = #tpu.core_type<tc>, window_params = [{transform_indices = @transform_0, window_bounds = array<i64: 2, 128>}, {transform_indices = @transform_1, window_bounds = array<i64: 2, 16>}, {pipeline_mode = #tpu.pipeline_mode<synchronous>, transform_indices = @transform_2, window_bounds = array<i64: 128, 256>}, {pipeline_mode = #tpu.pipeline_mode<synchronous>, transform_indices = @transform_3, window_bounds = array<i64: 16, 256>}, {pipeline_mode = #tpu.pipeline_mode<synchronous>, transform_indices = @transform_4, window_bounds = array<i64: 1, 256>}, {transform_indices = @transform_5, window_bounds = array<i64: 2, 256>}]} {
    %c0 = arith.constant 0 : index
    %c0_0 = arith.constant 0 : index
    %0 = vector.load %arg3[%c0, %c0_0] : memref<128x256xf32, #tpu.memory_space<vmem>>, vector<128x256xf32>
    %c0_1 = arith.constant 0 : index
    %c0_2 = arith.constant 0 : index
    %1 = vector.load %arg4[%c0_1, %c0_2] : memref<16x256xf32, #tpu.memory_space<vmem>>, vector<16x256xf32>
    %c0_3 = arith.constant 0 : index
    %c0_4 = arith.constant 0 : index
    %2 = vector.load %arg5[%c0_3, %c0_4] : memref<1x256xf32, #tpu.memory_space<vmem>>, vector<1x256xf32>
    %c0_i32 = arith.constant 0 : i32
    %3 = tpu.assume_multiple %c0_i32, 2 : i32
    %4 = arith.index_cast %3 : i32 to index
    %c0_5 = arith.constant 0 : index
    %5 = vector.load %arg1[%4, %c0_5] : memref<2x128xf32, #tpu.memory_space<vmem>>, vector<2x128xf32>
    %6 = arith.index_cast %3 : i32 to index
    %c0_6 = arith.constant 0 : index
    %7 = vector.load %arg2[%6, %c0_6] : memref<2x16xf32, #tpu.memory_space<vmem>>, vector<2x16xf32>
    %cst = arith.constant dense<0.000000e+00> : vector<2x256xf32>
    %8 = tpu.matmul %5, %0, %cst {dimension_numbers = #tpu.dot_dimension_numbers<[1], [0], [0], [1], [0, 0, 1, 1], [], []>} : vector<2x128xf32>, vector<128x256xf32>, vector<2x256xf32> -> vector<2x256xf32>
    %cst_7 = arith.constant dense<0.000000e+00> : vector<2x256xf32>
    %9 = tpu.matmul %7, %1, %cst_7 {dimension_numbers = #tpu.dot_dimension_numbers<[1], [0], [0], [1], [0, 0, 1, 1], [], []>} : vector<2x16xf32>, vector<16x256xf32>, vector<2x256xf32> -> vector<2x256xf32>
    %10 = arith.addf %8, %9 : vector<2x256xf32>
    %11 = vector.broadcast %2 : vector<1x256xf32> to vector<2x256xf32>
    %12 = arith.addf %10, %11 : vector<2x256xf32>
    %13 = arith.index_cast %3 : i32 to index
    %c0_8 = arith.constant 0 : index
    %14 = vector.load %arg6[%13, %c0_8] : memref<2x256xf32, #tpu.memory_space<vmem>>, vector<2x256xf32>
    tpu.vector_store %arg6[%13, %c0_8], %12 {strides = array<i32>} : memref<2x256xf32, #tpu.memory_space<vmem>>, vector<2x256xf32>,
    return
  }
  func.func @transform_0(%arg0: i32) -> (i32, i32) {
    %c0_i32 = arith.constant 0 : i32
    %c0_i32_0 = arith.constant 0 : i32
    return %arg0, %c0_i32 : i32, i32
  }
  func.func @transform_1(%arg0: i32) -> (i32, i32) {
    %c0_i32 = arith.constant 0 : i32
    %c0_i32_0 = arith.constant 0 : i32
    return %arg0, %c0_i32 : i32, i32
  }
  func.func @transform_2(%arg0: i32) -> (i32, i32) {
    %c0_i32 = arith.constant 0 : i32
    %c0_i32_0 = arith.constant 0 : i32
    %c0_i32_1 = arith.constant 0 : i32
    return %c0_i32, %c0_i32_0 : i32, i32
  }
  func.func @transform_3(%arg0: i32) -> (i32, i32) {
    %c0_i32 = arith.constant 0 : i32
    %c0_i32_0 = arith.constant 0 : i32
    %c0_i32_1 = arith.constant 0 : i32
    return %c0_i32, %c0_i32_0 : i32, i32
  }
  func.func @transform_4(%arg0: i32) -> (i32, i32) {
    %c0_i32 = arith.constant 0 : i32
    %c0_i32_0 = arith.constant 0 : i32
    %c0_i32_1 = arith.constant 0 : i32
    return %c0_i32, %c0_i32_0 : i32, i32
  }
  func.func @transform_5(%arg0: i32) -> (i32, i32) {
    %c0_i32 = arith.constant 0 : i32
    %c0_i32_0 = arith.constant 0 : i32
    return %arg0, %c0_i32 : i32, i32
  }
}

</mosaic_0001>

<bundles_post_ra>
// kernel: tpu_custom_call.1
= control target key start
LH: loop header
LB: loop body
LE: loop exit
PB: predicated region body
PF: predicated region fallthrough
CT: control target
= control target key end

     0   :  { %10 = vsyncpa [#allocation3], 0  ;;  %s527_s0 = inlined_call_operand.hbm [shape: f32[2,128], index: 0, kind: input, shape index: {}]   ;;  %s528_s1 = inlined_call_operand.vmem [shape: f32[2,16], index: 1, kind: input, shape index: {}]   ;;  %s529_s2 = inlined_call_operand.hbm [shape: f32[128,256], index: 2, kind: input, shape index: {}]   ;;  %s530_s3 = inlined_call_operand.hbm [shape: f32[16,256], index: 3, kind: input, shape index: {}]   ;;  %s531_s4 = inlined_call_operand.vmem [shape: f32[1,256], index: 4, kind: input, shape index: {}]   ;;  %s532_s5 = inlined_call_operand.hbm [shape: f32[2,256], index: 5, kind: output, shape index: {}]  }
   0x1   :  { %11 = vsyncpa [#allocation6], 0 }
   0x2   :  { %12 = vsyncpa [#allocation4], 0  ;;  %s430_s18 = smov [#allocation5]   ;;  %s336_s22 = scalar_lea.hbm %s529_s2, 4096 }
   0x3   :  { %s30_s19 = sshll.u32 %s430_s18, 4  ;;  %p337_p0 = scmp.ne.s32.totalorder %s529_s2, %s336_s22  ;;  %s31_s19 = int_to_ptr.vmem [resolvable:$true] %s30_s19 }
   0x4   :  { %p340_p1 = scmp.lt.u32.totalorder %s336_s22, %s529_s2 }
   0x6   :  { %p342_p2 = pnand %p340_p1, %p337_p0 }
   0x8   :  { %345 = shalt.err (!%p342_p2)
}
   0x9   :  { %s346_s27 = scalar_lea.vmem %s31_s19, 4096  ;;  %p351_p4 = scmp.lt.s32.totalorder %s31_s19, %s31_s19 }
   0xa   :  { %p347_p3 = scmp.ne.s32.totalorder %s31_s19, %s346_s27  ;;  %p352_p5 = scmp.lt.s32.totalorder %s346_s27, %s346_s27 }
   0xc   :  { %p353_p6 = por %p352_p5, %p351_p4 }
   0xe   :  { %p354_p7 = pnand %p353_p6, %p347_p3 }
  0x10   :  { %357 = shalt.err (!%p354_p7)
}
  0x11   :  { %s431_s28 = smov 256   ;;  %s432_s29 = smov 16  }
  0x12   :  { %36 = dma.hbm_to_vmem [thread:$0]  %s529_s2, 4096, %s31_s19, [#allocation6], %s431_s28, %s431_s28, %s432_s29  }
  0x13   :  { %s433_s7 = smov [#allocation2]   ;;  %s434_s9 = smov [#allocation7]  }
  0x14   :  { %s19_s8 = sshll.u32 %s433_s7, 4  ;;  %s42_s10 = sshll.u32 %s434_s9, 4  ;;  %s20_s8 = int_to_ptr.vmem [resolvable:$true] %s19_s8  ;;  %s43_s10 = int_to_ptr.vmem [resolvable:$true] %s42_s10 }
  0x15   :  { %s358_s13 = scalar_lea.hbm %s527_s0, 32 }
  0x16   :  { %p359_p8 = scmp.ne.s32.totalorder %s527_s0, %s358_s13  ;;  %p362_p9 = scmp.lt.u32.totalorder %s358_s13, %s527_s0 }
  0x18   :  { %p364_p10 = pnand %p362_p9, %p359_p8 }
  0x1a   :  { %367 = shalt.err (!%p364_p10)
}
  0x1b   :  { %s368_s2 = scalar_lea.vmem %s20_s8, 32  ;;  %p373_p12 = scmp.lt.s32.totalorder %s20_s8, %s20_s8 }
  0x1c   :  { %p369_p11 = scmp.ne.s32.totalorder %s20_s8, %s368_s2  ;;  %p374_p13 = scmp.lt.s32.totalorder %s368_s2, %s368_s2 }
  0x1e   :  { %p375_p0 = por %p374_p13, %p373_p12 }
  0x20   :  { %p376_p1 = pnand %p375_p0, %p369_p11 }
  0x22   :  { %379 = shalt.err (!%p376_p1)
}
  0x23   :  { %22 = dma.hbm_to_vmem [thread:$0]  %s527_s0, 32, %s20_s8, [#allocation3]  }
  0x24   :  { %s380_s22 = scalar_lea.hbm %s530_s3, 512 }
  0x25   :  { %p381_p2 = scmp.ne.s32.totalorder %s530_s3, %s380_s22  ;;  %p384_p3 = scmp.lt.u32.totalorder %s380_s22, %s530_s3 }
  0x27   :  { %p386_p4 = pnand %p384_p3, %p381_p2 }
  0x29   :  { %389 = shalt.err (!%p386_p4)
}
  0x2a   :  { %s390_s27 = scalar_lea.vmem %s43_s10, 512  ;;  %p395_p6 = scmp.lt.s32.totalorder %s43_s10, %s43_s10 }
  0x2b   :  { %p391_p5 = scmp.ne.s32.totalorder %s43_s10, %s390_s27  ;;  %p396_p7 = scmp.lt.s32.totalorder %s390_s27, %s390_s27 }
  0x2d   :  { %p397_p8 = por %p396_p7, %p395_p6 }
  0x2f   :  { %p398_p9 = pnand %p397_p8, %p391_p5 }
  0x31   :  { %401 = shalt.err (!%p398_p9)
}
  0x32   :  { %48 = dma.hbm_to_vmem [thread:$0]  %s530_s3, 512, %s43_s10, [#allocation6], %s431_s28, %s431_s28, %s432_s29  }
  0x33   :  { %424 = dma.done.wait [#allocation3], 32  }
  0x34   :  { %425 = vsyncadd [#allocation3], 4294967264 }
  0x35   :  { %426 = dma.done.wait [#allocation6], 4608  }
  0x36   :  { %427 = vsyncadd [#allocation6], 4294962688  ;;  %v435_v0 = vmov 0.0   ;;  %v61_v1 = vld [vmem:[#allocation5 + $0x8] sm:$0xff]  ;;  %v63_v2 = vld [vmem:[#allocation5 + $0x18] sm:$0xff]  ;;  %vm99_vm0 = vcmask 130048   ;;  %v246_v59 = vlaneseq }
  0x37   :  { %167 = vmatprep.mubr.f32.mxu1 %v435_v0  ;;  %238 = vmatprep.mubr.f32.mxu0 %v435_v0  ;;  %v60_v3 = vld [vmem:[#allocation5] sm:$0xff]  ;;  %v295_v4 = vpack.c.bf16 %v63_v2, %v61_v1  ;;  %v62_v5 = vld [vmem:[#allocation5 + $0x10] sm:$0xff]  ;;  %v65_v6 = vld [vmem:[#allocation5 + $0x28] sm:$0xff]  ;;  %s436_s6 = smov [#allocation8]  }
  0x38   :  { %v67_v7 = vld [vmem:[#allocation5 + $0x38] sm:$0xff]  ;;  %v297_v8 = vpack.c.bf16 %v62_v5, %v60_v3  ;;  %v64_v10 = vld [vmem:[#allocation5 + $0x20] sm:$0xff]  ;;  %v66_v11 = vld [vmem:[#allocation5 + $0x30] sm:$0xff]  ;;  %v247_v60 = vshrl.u32 %v246_v59, 7  ;;  %s279_s7 = sshll.u32 %s436_s6, 4  ;;  %s280_s7 = int_to_ptr.vmem [resolvable:$true] %s279_s7 }
  0x39   :  { %v299_v9 = vpack.c.bf16 %v67_v7, %v65_v6  ;;  %v69_v12 = vld [vmem:[#allocation5 + $0x48] sm:$0xff]  ;;  %296 = vmatprep.subr.bf16.mxu0 %v295_v4  ;;  %v71_v13 = vld [vmem:[#allocation5 + $0x58] sm:$0xff]  ;;  %v301_v14 = vpack.c.bf16 %v66_v11, %v64_v10  ;;  %v68_v16 = vld [vmem:[#allocation5 + $0x40] sm:$0xff]  ;;  %s402_s8 = scalar_lea.vmem %s280_s7, 64  ;;  %p407_p11 = scmp.lt.s32.totalorder %s280_s7, %s280_s7 }
  0x3a   :  { %298 = vmatpush1.bf16.msra.mxu0 %v297_v8  ;;  %v303_v15 = vpack.c.bf16 %v71_v13, %v69_v12  ;;  %v70_v17 = vld [vmem:[#allocation5 + $0x50] sm:$0xff]  ;;  %v73_v18 = vld [vmem:[#allocation5 + $0x68] sm:$0xff]  ;;  %v75_v19 = vld [vmem:[#allocation5 + $0x78] sm:$0xff]  ;;  %v248_v61 = vsub.s32 0, %v247_v60  ;;  %v252_v63 = vsub.s32 1, %v247_v60  ;;  %p403_p10 = scmp.ne.s32.totalorder %s280_s7, %s402_s8  ;;  %p408_p12 = scmp.lt.s32.totalorder %s402_s8, %s402_s8 }
  0x3b   :  { %300 = vmatprep.subr.bf16.mxu0 %v299_v9  ;;  %v305_v20 = vpack.c.bf16 %v70_v17, %v68_v16  ;;  %v72_v21 = vld [vmem:[#allocation5 + $0x60] sm:$0xff]  ;;  %v74_v22 = vld [vmem:[#allocation5 + $0x70] sm:$0xff]  ;;  %v307_v23 = vpack.c.bf16 %v75_v19, %v73_v18  ;;  %v77_v24 = vld [vmem:[#allocation5 + $0x88] sm:$0xff] }
  0x3c   :  { %v93_v25 = vld [vmem:[#allocation7 + $0x8] sm:$0xff]  ;;  %v95_v26 = vld [vmem:[#allocation7 + $0x18] sm:$0xff]  ;;  %v92_v29 = vld [vmem:[#allocation7] sm:$0xff]  ;;  %v309_v32 = vpack.c.bf16 %v74_v22, %v72_v21  ;;  %p409_p13 = por %p408_p12, %p407_p11 }
  0x3d   :  { %v79_v27 = vld [vmem:[#allocation5 + $0x98] sm:$0xff]  ;;  %v291_v28 = vpack.c.bf16 %v95_v26, %v93_v25  ;;  %v94_v30 = vld [vmem:[#allocation7 + $0x10] sm:$0xff]  ;;  %v76_v34 = vld [vmem:[#allocation5 + $0x80] sm:$0xff] }
  0x3e   :  { %302 = vmatpush1.bf16.msra.mxu0 %v301_v14  ;;  %v293_v31 = vpack.c.bf16 %v94_v30, %v92_v29  ;;  %v311_v33 = vpack.c.bf16 %v79_v27, %v77_v24  ;;  %v78_v35 = vld [vmem:[#allocation5 + $0x90] sm:$0xff]  ;;  %v98_v36 = vld [vmem:[%s528_s1] sm:$0x3]  ;;  %v81_v37 = vld [vmem:[#allocation5 + $0xa8] sm:$0xff]  ;;  %p410_p0 = pnand %p409_p13, %p403_p10 }
  0x3f   :  { %304 = vmatprep.subr.bf16.mxu0 %v303_v15  ;;  %292 = vmatprep.subr.bf16.mxu1 %v291_v28  ;;  %v83_v38 = vld [vmem:[#allocation5 + $0xb8] sm:$0xff]  ;;  %v313_v39 = vpack.c.bf16 %v78_v35, %v76_v34  ;;  %v80_v41 = vld [vmem:[#allocation5 + $0xa0] sm:$0xff]  ;;  %v82_v42 = vld [vmem:[#allocation5 + $0xb0] sm:$0xff] }
  0x40   :  { %294 = vmatpush1.bf16.msra.mxu1 %v293_v31  ;;  %v315_v40 = vpack.c.bf16 %v83_v38, %v81_v37  ;;  %v85_v43 = vld [vmem:[#allocation5 + $0xc8] sm:$0xff]  ;;  %v87_v44 = vld [vmem:[#allocation5 + $0xd8] sm:$0xff]  ;;  %v317_v45 = vpack.c.bf16 %v82_v42, %v80_v41  ;;  %v84_v47 = vld [vmem:[#allocation5 + $0xc0] sm:$0xff] }
  0x41   :  { %v319_v46 = vpack.c.bf16 %v87_v44, %v85_v43  ;;  %v86_v48 = vld [vmem:[#allocation5 + $0xd0] sm:$0xff]  ;;  %v89_v49 = vld [vmem:[#allocation5 + $0xe8] sm:$0xff]  ;;  %v91_v50 = vld [vmem:[#allocation5 + $0xf8] sm:$0xff] }
  0x42   :  { %306 = vmatpush1.bf16.msra.mxu0 %v305_v20  ;;  %v321_v51 = vpack.c.bf16 %v86_v48, %v84_v47  ;;  %v323_v52 = vpack.c.bf16 %v91_v50, %v89_v49  ;;  %v88_v53 = vld [vmem:[#allocation5 + $0xe0] sm:$0xff]  ;;  %v90_v54 = vld [vmem:[#allocation5 + $0xf0] sm:$0xff]  ;;  %v97_v56 = vld [vmem:[#allocation2] sm:$0x3] }
  0x43   :  { %308 = vmatprep.subr.bf16.mxu0 %v307_v23  ;;  %289 = vmatmul.mubr.msk.f32.vlgmr.msra.gmra.mrb[0].mxu1 %vm99_vm0, %v98_v36  ;;  %v325_v55 = vpack.c.bf16 %v90_v54, %v88_v53  ;;  %v96_v62 = vld [vmem:[%s531_s4] sm:$0x3] }
  0x44   :  { %v249_v0 = vrot.slane %v96_v62, %v248_v61  ;;  %v253_v2 = vrot.slane %v96_v62, %v252_v63 }
  0x46   :  { %310 = vmatpush1.bf16.msra.mxu0 %v309_v32 }
  0x47   :  { %312 = vmatprep.subr.bf16.mxu0 %v311_v33 }
  0x4a   :  { %314 = vmatpush1.bf16.msra.mxu0 %v313_v39 }
  0x4b   :  { %316 = vmatprep.subr.bf16.mxu0 %v315_v40 }
  0x4e   :  { %318 = vmatpush1.bf16.msra.mxu0 %v317_v45 }
  0x4f   :  { %320 = vmatprep.subr.bf16.mxu0 %v319_v46 }
  0x52   :  { %322 = vmatpush1.bf16.msra.mxu0 %v321_v51 }
  0x53   :  { %324 = vmatprep.subr.bf16.mxu0 %v323_v52 }
  0x56   :  { %326 = vmatpush1.bf16.msra.mxu0 %v325_v55 }
  0x59   :  { %239 = vmatmul.mubr.f32.vlgmr.msra.gmra.mrb[0].mxu0 %v97_v56 }
 0x116   :  { %v169_v57 = vpop.f32.mrb[0].mxu1 }
 0x117   :  { %v171_v58 = vpop.f32.mrb[1].mxu1 }
 0x12c   :  { %v240_v1 = vpop.f32.mrb[0].mxu0 }
 0x12d   :  { %v241_v3 = vadd.f32 %v240_v1, %v169_v57  ;;  %v242_v4 = vpop.f32.mrb[1].mxu0 }
 0x12e   :  { %v243_v5 = vadd.f32 %v242_v4, %v171_v58 }
 0x12f   :  { %v256_v6 = vadd.f32 %v249_v0, %v241_v3 }
 0x130   :  { %v257_v7 = vadd.f32 %v253_v2, %v243_v5 }
 0x132   :  { %v260_v8 = vcombine.low %v256_v6, %v257_v7 }
 0x134   :  { %290 = vst.sshfl [vmem:[#allocation8] sm:$0x33 pattern:$0x76325410] %v260_v8 }
 0x135   :  { %413 = shalt.err (!%p410_p0)
}
 0x136   :  { %s414_s10 = scalar_lea.hbm %s532_s5, 64 }
 0x137   :  { %p415_p1 = scmp.ne.s32.totalorder %s532_s5, %s414_s10  ;;  %p418_p2 = scmp.lt.u32.totalorder %s414_s10, %s532_s5 }
 0x139   :  { %p420_p3 = pnand %p418_p2, %p415_p1 }
 0x13b   :  { %423 = shalt.err (!%p420_p3)
}
 0x13c   :  { %282 = dma.vmem_to_hbm [thread:$0]  %s280_s7, 64, %s532_s5, [#allocation4]  }
 0x13d   :  { %428 = dma.done.wait [#allocation4], 64  }
 0x13e   :  { %429 = vsyncadd [#allocation4], 4294967232 }
 0x13f   :  { %286 = vsyncpa [#allocation3], 1 }
 0x140   :  { %287 = vsyncpa [#allocation6], 1 }
 0x141   :  { %288 = vsyncpa [#allocation4], 1 }

</bundles_post_ra>
